<compile_context>
chip_gen: v7x
topology: tpu7x:2x2x1
jax: 0.10.0
libtpu: 0.0.40
codegen_flags: <defaults>
</compile_context>

<pallas_src>
import functools

import jax
import jax.numpy as jnp
from jax.experimental import pallas as pl
from jax.experimental.pallas import tpu as pltpu


_LANE = 128            # lane width (hardware vreg layout)
_MAX_SUB = 512         # max sublanes per block -> up to 512*128 joints / block
_MIN_PALLAS_JOINTS = 2048  # below this a plain XLA fusion wins (launch overhead)


# ------------------ fast shared-range-reduction sin/cos ----------------------
def _sincos(a):
    """Return (sin(a), cos(a)) sharing one Cody-Waite range reduction.

    Cephes-style f32 polynomials on [-pi/4, pi/4]; accurate to ~1e-7 for
    angles up to a few hundred radians. jnp.sin / jnp.cos each redo their own
    range reduction, roughly doubling the VALU work of this kernel.
    """
    two_over_pi = 0.6366197723675814
    k = jnp.floor(a * two_over_pi + 0.5)                 # nearest quadrant
    # 3-term Cody-Waite split of pi/2 (leading terms exactly representable).
    r = a - k * 1.5703125
    r = r - k * 4.837512969970703125e-4
    r = r - k * 7.54978995489188216e-8
    z = r * r
    sin_r = r + r * z * ((-1.9515295891e-4 * z + 8.3321608736e-3) * z
                         - 1.6666654611e-1)
    cos_r = 1.0 - 0.5 * z + z * z * ((2.443315711809948e-5 * z
                                      - 1.388731625493765e-3) * z
                                     + 4.166664568298827e-2)
    ki = k.astype(jnp.int32)
    swap = (ki & 1) != 0                         # quadrants 1, 3: swap sin/cos
    s = jnp.where(swap, cos_r, sin_r)
    c = jnp.where(swap, sin_r, cos_r)
    s = jnp.where((ki & 2) != 0, -s, s)          # quadrants 2, 3: negate sin
    c = jnp.where(((ki + 1) & 2) != 0, -c, c)    # quadrants 1, 2: negate cos
    return s, c


# ----------------------- symbolic 3x3 algebra helpers ------------------------
_ZERO = object()     # exact structural zero
_ONE = object()      # exact structural one


def _sym_axis_rot(axis, c, s):
    """Single-axis rotation matrix with structural zeros/ones as sentinels."""
    ns = -s
    if axis == 'x':
        return [[_ONE, _ZERO, _ZERO],
                [_ZERO, c, ns],
                [_ZERO, s, c]]
    elif axis == 'y':
        return [[c, _ZERO, s],
                [_ZERO, _ONE, _ZERO],
                [ns, _ZERO, c]]
    elif axis == 'z':
        return [[c, ns, _ZERO],
                [s, c, _ZERO],
                [_ZERO, _ZERO, _ONE]]
    else:
        raise ValueError('Wrong axis value {}'.format(axis))


def _sym_mul(a, b):
    if a is _ZERO or b is _ZERO:
        return _ZERO
    if a is _ONE:
        return b
    if b is _ONE:
        return a
    return a * b


def _sym_matmul3(A, B, make_ones):
    """3x3 product with zero/one pruning; entries are arrays or sentinels."""
    out = []
    for r in range(3):
        row = []
        for c in range(3):
            terms = [_sym_mul(A[r][k], B[k][c]) for k in range(3)]
            terms = [t for t in terms if t is not _ZERO]
            if not terms:
                row.append(_ZERO)
            elif len(terms) == 1:
                row.append(terms[0])
            else:
                terms = [make_ones() if t is _ONE else t for t in terms]
                acc = terms[0]
                for t in terms[1:]:
                    acc = acc + t
                row.append(acc)
        out.append(row)
    return out


# --------------------------------- kernel ------------------------------------
def _euler_kernel(ang_ref, out_ref, *, euler_order, fast_sincos):
    # ang_ref: (3, S, 128) f32; out_ref: (9, S, 128) f32
    a1 = ang_ref[0]                       # (S, 128) full-sublane tile
    a2 = ang_ref[1]
    a3 = ang_ref[2]

    shape = a1.shape
    dtype = a1.dtype

    if fast_sincos:
        s1, c1 = _sincos(a1)
        s2, c2 = _sincos(a2)
        s3, c3 = _sincos(a3)
    else:
        s1, c1 = jnp.sin(a1), jnp.cos(a1)
        s2, c2 = jnp.sin(a2), jnp.cos(a2)
        s3, c3 = jnp.sin(a3), jnp.cos(a3)

    # Hoisted constant tiles (JAX does not CSE broadcast_in_dim).
    cache = {}

    def make_ones():
        if 'one' not in cache:
            cache['one'] = jnp.ones(shape, dtype)
        return cache['one']

    def make_zeros():
        if 'zero' not in cache:
            cache['zero'] = jnp.zeros(shape, dtype)
        return cache['zero']

    R1 = _sym_axis_rot(euler_order[0], c1, s1)
    R2 = _sym_axis_rot(euler_order[1], c2, s2)
    R3 = _sym_axis_rot(euler_order[2], c3, s3)

    R = _sym_matmul3(_sym_matmul3(R1, R2, make_ones), R3, make_ones)

    # Nine unmasked full-tile stores to static sublane-major rows.
    for r in range(3):
        for c in range(3):
            e = R[r][c]
            if e is _ZERO:
                e = make_zeros()
            elif e is _ONE:
                e = make_ones()
            out_ref[3 * r + c] = e


# -------------------------------- wrapper ------------------------------------
def euler_decoder_forward(euler_angles, euler_order='xyz', *,
                          fast_sincos=True, force_pallas=False,
                          channel_major_output=False):
    """Pallas equivalent of EulerDecoder.forward.

    euler_angles: (B, J, 3) float32
    returns     : (B, J, 3, 3) float32 (or (9, B*J) if channel_major_output)
    """
    B, J, three = euler_angles.shape
    assert three == 3
    N = B * J

    if N < _MIN_PALLAS_JOINTS and not force_pallas:
        # Tiny problem: a Pallas launch + the wrapper layout copies is pure
        # fixed overhead; a plain XLA elementwise fusion is faster.
        rot = euler_decoder_reference(euler_angles, euler_order)
        if channel_major_output:
            return rot.reshape(N, 9).T
        return rot

    # Lane columns of 128 joints each.
    M = pl.cdiv(N, _LANE)
    if M <= 8:
        # Single block covering the whole array (non-multiple-of-8 sublane
        # count is allowed when the block equals the full array dim).
        S = M
        M_pad = M
        n_blocks = 1
    else:
        # Large multiple-of-8 sublane blocks (amortize per-step pipeline
        # overhead), with an even block count so the single "parallel" grid
        # axis splits across both v7x TensorCores.
        n_blocks = pl.cdiv(M, _MAX_SUB)
        if n_blocks % 2:
            n_blocks += 1
        S = min(_MAX_SUB, max(8, (pl.cdiv(M, n_blocks) + 7) // 8 * 8))
        M_pad = pl.cdiv(M, S) * S
        n_blocks = M_pad // S
    N_pad = M_pad * _LANE

    # TODO(synk): this input-side (N,3)->(3,N) transpose + pad adds ~24 B/joint
    # of HBM traffic; a producer emitting channel-major angles would avoid it.
    ang = euler_angles.reshape(N, 3).astype(jnp.float32).T          # (3, N)
    ang = jnp.pad(ang, ((0, 0), (0, N_pad - N)))                    # (3, N_pad)
    ang = ang.reshape(3, M_pad, _LANE)

    out = pl.pallas_call(
        functools.partial(_euler_kernel, euler_order=euler_order,
                          fast_sincos=fast_sincos),
        out_shape=jax.ShapeDtypeStruct((9, M_pad, _LANE), jnp.float32),
        grid=(n_blocks,),
        in_specs=[pl.BlockSpec((3, S, _LANE), lambda i: (0, i, 0))],
        out_specs=pl.BlockSpec((9, S, _LANE), lambda i: (0, i, 0)),
        compiler_params=pltpu.CompilerParams(
            dimension_semantics=("parallel",),
            vmem_limit_bytes=32 << 20),
    )(ang)

    rot9 = out.reshape(9, N_pad)[:, :N]            # (9, N) channel-major
    if channel_major_output:
        # Fused consumers should read this layout directly and skip the
        # transpose below entirely.
        return rot9
    # TODO(synk): the final transpose back to (B, J, 3, 3) is pure layout
    # plumbing (~72 B/joint of extra HBM traffic); prefer
    # channel_major_output=True when the consumer can read the (9, N) slab.
    return rot9.T.reshape(B, J, 3, 3)


# ---------------- pure-JAX reference (and tiny-problem fallback) -------------
def _ref_axis_mat(angle, axis):
    c = jnp.cos(angle).reshape(-1)
    s = jnp.sin(angle).reshape(-1)
    z = jnp.zeros_like(c)
    o = jnp.ones_like(c)
    if axis == 'x':
        m = jnp.stack([o, z, z, z, c, -s, z, s, c], axis=1)
    elif axis == 'y':
        m = jnp.stack([c, z, s, z, o, z, -s, z, c], axis=1)
    elif axis == 'z':
        m = jnp.stack([c, -s, z, s, c, z, z, z, o], axis=1)
    else:
        raise ValueError(axis)
    return m.reshape(-1, 3, 3)


def euler_decoder_reference(euler_angles, euler_order='xyz'):
    B, J, _ = euler_angles.shape
    a1, a2, a3 = jnp.split(euler_angles, 3, axis=-1)
    r1 = _ref_axis_mat(a1, euler_order[0])
    r2 = _ref_axis_mat(a2, euler_order[1])
    r3 = _ref_axis_mat(a3, euler_order[2])
    r = r1 @ r2 @ r3
    return r.reshape(B, J, 3, 3)


if __name__ == "__main__":
    # EulerDecoder has no learnable parameters; nothing to initialize.
    key = jax.random.PRNGKey(0)
    k1, k2 = jax.random.split(key)

    # Small case (module-scale shapes): single-block Pallas path.
    B1, J1 = 2, 8
    ang_small = jax.random.uniform(k1, (B1, J1, 3), dtype=jnp.float32,
                                   minval=-3.0, maxval=3.0)
    rot_small = jax.block_until_ready(
        euler_decoder_forward(ang_small, euler_order='xyz', force_pallas=True))
    ref_small = euler_decoder_reference(ang_small, 'xyz')
    assert rot_small.shape == (B1, J1, 3, 3)
    assert jnp.allclose(rot_small, ref_small, atol=1e-5, rtol=1e-5)

    # Medium case: exercises the multi-block grid, sublane padding (N not a
    # multiple of S*128) and the even-block-count megacore split.
    B2, J2 = 4, 600
    ang_med = jax.random.uniform(k2, (B2, J2, 3), dtype=jnp.float32,
                                 minval=-3.0, maxval=3.0)
    rot_med = jax.block_until_ready(
        euler_decoder_forward(ang_med, euler_order='zyx'))
    ref_med = euler_decoder_reference(ang_med, 'zyx')
    assert rot_med.shape == (B2, J2, 3, 3)
    assert jnp.allclose(rot_med, ref_med, atol=1e-5, rtol=1e-5)

    print("KERNEL_OK")
</pallas_src>

<mosaic_0001>
module attributes {stable_mosaic.version = 11 : i64} {
  func.func @_euler_kernel(%arg0: i32, %arg1: memref<3x1x128xf32, #tpu.memory_space<vmem>>, %arg2: memref<9x1x128xf32, #tpu.memory_space<vmem>>) attributes {dimension_semantics = [#tpu.dimension_semantics<parallel>], iteration_bounds = array<i64: 1>, scalar_prefetch = 0 : i64, scratch_operands = 0 : i64, tpu.core_type = #tpu.core_type<tc>, window_params = [{transform_indices = @transform_0, window_bounds = array<i64: 3, 1, 128>}, {transform_indices = @transform_1, window_bounds = array<i64: 9, 1, 128>}]} {
    %c0 = arith.constant 0 : index
    %c0_0 = arith.constant 0 : index
    %c0_1 = arith.constant 0 : index
    %0 = vector.load %arg1[%c0, %c0_0, %c0_1] : memref<3x1x128xf32, #tpu.memory_space<vmem>>, vector<1x1x128xf32>
    %1 = vector.shape_cast %0 : vector<1x1x128xf32> to vector<1x128xf32>
    %c1 = arith.constant 1 : index
    %c0_2 = arith.constant 0 : index
    %c0_3 = arith.constant 0 : index
    %2 = vector.load %arg1[%c1, %c0_2, %c0_3] : memref<3x1x128xf32, #tpu.memory_space<vmem>>, vector<1x1x128xf32>
    %3 = vector.shape_cast %2 : vector<1x1x128xf32> to vector<1x128xf32>
    %c2 = arith.constant 2 : index
    %c0_4 = arith.constant 0 : index
    %c0_5 = arith.constant 0 : index
    %4 = vector.load %arg1[%c2, %c0_4, %c0_5] : memref<3x1x128xf32, #tpu.memory_space<vmem>>, vector<1x1x128xf32>
    %5 = vector.shape_cast %4 : vector<1x1x128xf32> to vector<1x128xf32>
    %cst = arith.constant 0.636619746 : f32
    %6 = vector.broadcast %cst : f32 to vector<1x128xf32>
    %7 = arith.mulf %1, %6 : vector<1x128xf32>
    %cst_6 = arith.constant 5.000000e-01 : f32
    %8 = vector.broadcast %cst_6 : f32 to vector<1x128xf32>
    %9 = arith.addf %7, %8 : vector<1x128xf32>
    %10 = math.floor %9 : vector<1x128xf32>
    %cst_7 = arith.constant 1.5703125 : f32
    %11 = vector.broadcast %cst_7 : f32 to vector<1x128xf32>
    %12 = arith.mulf %10, %11 : vector<1x128xf32>
    %13 = arith.subf %1, %12 : vector<1x128xf32>
    %cst_8 = arith.constant 4.83751297E-4 : f32
    %14 = vector.broadcast %cst_8 : f32 to vector<1x128xf32>
    %15 = arith.mulf %10, %14 : vector<1x128xf32>
    %16 = arith.subf %13, %15 : vector<1x128xf32>
    %cst_9 = arith.constant 7.549790e-08 : f32
    %17 = vector.broadcast %cst_9 : f32 to vector<1x128xf32>
    %18 = arith.mulf %10, %17 : vector<1x128xf32>
    %19 = arith.subf %16, %18 : vector<1x128xf32>
    %20 = arith.mulf %19, %19 : vector<1x128xf32>
    %21 = arith.mulf %19, %20 : vector<1x128xf32>
    %cst_10 = arith.constant -1.95152956E-4 : f32
    %22 = vector.broadcast %cst_10 : f32 to vector<1x128xf32>
    %23 = arith.mulf %22, %20 : vector<1x128xf32>
    %cst_11 = arith.constant 0.00833216123 : f32
    %24 = vector.broadcast %cst_11 : f32 to vector<1x128xf32>
    %25 = arith.addf %23, %24 : vector<1x128xf32>
    %26 = arith.mulf %25, %20 : vector<1x128xf32>
    %cst_12 = arith.constant 0.166666552 : f32
    %27 = vector.broadcast %cst_12 : f32 to vector<1x128xf32>
    %28 = arith.subf %26, %27 : vector<1x128xf32>
    %29 = arith.mulf %21, %28 : vector<1x128xf32>
    %30 = arith.addf %19, %29 : vector<1x128xf32>
    %cst_13 = arith.constant 5.000000e-01 : f32
    %31 = vector.broadcast %cst_13 : f32 to vector<1x128xf32>
    %32 = arith.mulf %31, %20 : vector<1x128xf32>
    %cst_14 = arith.constant 1.000000e+00 : f32
    %33 = vector.broadcast %cst_14 : f32 to vector<1x128xf32>
    %34 = arith.subf %33, %32 : vector<1x128xf32>
    %35 = arith.mulf %20, %20 : vector<1x128xf32>
    %cst_15 = arith.constant 2.44331568E-5 : f32
    %36 = vector.broadcast %cst_15 : f32 to vector<1x128xf32>
    %37 = arith.mulf %36, %20 : vector<1x128xf32>
    %cst_16 = arith.constant 0.00138873165 : f32
    %38 = vector.broadcast %cst_16 : f32 to vector<1x128xf32>
    %39 = arith.subf %37, %38 : vector<1x128xf32>
    %40 = arith.mulf %39, %20 : vector<1x128xf32>
    %cst_17 = arith.constant 0.0416666456 : f32
    %41 = vector.broadcast %cst_17 : f32 to vector<1x128xf32>
    %42 = arith.addf %40, %41 : vector<1x128xf32>
    %43 = arith.mulf %35, %42 : vector<1x128xf32>
    %44 = arith.addf %34, %43 : vector<1x128xf32>
    %45 = arith.fptosi %10 : vector<1x128xf32> to vector<1x128xi32>
    %c1_i32 = arith.constant 1 : i32
    %46 = vector.broadcast %c1_i32 : i32 to vector<1x128xi32>
    %47 = arith.andi %45, %46 : vector<1x128xi32>
    %c0_i32 = arith.constant 0 : i32
    %48 = vector.broadcast %c0_i32 : i32 to vector<1x128xi32>
    %49 = arith.cmpi ne, %47, %48 : vector<1x128xi32>
    %50 = arith.select %49, %44, %30 : vector<1x128xi1>, vector<1x128xf32>
    %51 = arith.select %49, %30, %44 : vector<1x128xi1>, vector<1x128xf32>
    %c2_i32 = arith.constant 2 : i32
    %52 = vector.broadcast %c2_i32 : i32 to vector<1x128xi32>
    %53 = arith.andi %45, %52 : vector<1x128xi32>
    %c0_i32_18 = arith.constant 0 : i32
    %54 = vector.broadcast %c0_i32_18 : i32 to vector<1x128xi32>
    %55 = arith.cmpi ne, %53, %54 : vector<1x128xi32>
    %cst_19 = arith.constant 0.000000e+00 : f32
    %56 = vector.broadcast %cst_19 : f32 to vector<1x128xf32>
    %57 = arith.subf %56, %50 : vector<1x128xf32>
    %58 = arith.select %55, %57, %50 : vector<1x128xi1>, vector<1x128xf32>
    %c1_i32_20 = arith.constant 1 : i32
    %59 = vector.broadcast %c1_i32_20 : i32 to vector<1x128xi32>
    %60 = arith.addi %45, %59 : vector<1x128xi32>
    %c2_i32_21 = arith.constant 2 : i32
    %61 = vector.broadcast %c2_i32_21 : i32 to vector<1x128xi32>
    %62 = arith.andi %60, %61 : vector<1x128xi32>
    %c0_i32_22 = arith.constant 0 : i32
    %63 = vector.broadcast %c0_i32_22 : i32 to vector<1x128xi32>
    %64 = arith.cmpi ne, %62, %63 : vector<1x128xi32>
    %cst_23 = arith.constant 0.000000e+00 : f32
    %65 = vector.broadcast %cst_23 : f32 to vector<1x128xf32>
    %66 = arith.subf %65, %51 : vector<1x128xf32>
    %67 = arith.select %64, %66, %51 : vector<1x128xi1>, vector<1x128xf32>
    %cst_24 = arith.constant 0.636619746 : f32
    %68 = vector.broadcast %cst_24 : f32 to vector<1x128xf32>
    %69 = arith.mulf %3, %68 : vector<1x128xf32>
    %cst_25 = arith.constant 5.000000e-01 : f32
    %70 = vector.broadcast %cst_25 : f32 to vector<1x128xf32>
    %71 = arith.addf %69, %70 : vector<1x128xf32>
    %72 = math.floor %71 : vector<1x128xf32>
    %cst_26 = arith.constant 1.5703125 : f32
    %73 = vector.broadcast %cst_26 : f32 to vector<1x128xf32>
    %74 = arith.mulf %72, %73 : vector<1x128xf32>
    %75 = arith.subf %3, %74 : vector<1x128xf32>
    %cst_27 = arith.constant 4.83751297E-4 : f32
    %76 = vector.broadcast %cst_27 : f32 to vector<1x128xf32>
    %77 = arith.mulf %72, %76 : vector<1x128xf32>
    %78 = arith.subf %75, %77 : vector<1x128xf32>
    %cst_28 = arith.constant 7.549790e-08 : f32
    %79 = vector.broadcast %cst_28 : f32 to vector<1x128xf32>
    %80 = arith.mulf %72, %79 : vector<1x128xf32>
    %81 = arith.subf %78, %80 : vector<1x128xf32>
    %82 = arith.mulf %81, %81 : vector<1x128xf32>
    %83 = arith.mulf %81, %82 : vector<1x128xf32>
    %cst_29 = arith.constant -1.95152956E-4 : f32
    %84 = vector.broadcast %cst_29 : f32 to vector<1x128xf32>
    %85 = arith.mulf %84, %82 : vector<1x128xf32>
    %cst_30 = arith.constant 0.00833216123 : f32
    %86 = vector.broadcast %cst_30 : f32 to vector<1x128xf32>
    %87 = arith.addf %85, %86 : vector<1x128xf32>
    %88 = arith.mulf %87, %82 : vector<1x128xf32>
    %cst_31 = arith.constant 0.166666552 : f32
    %89 = vector.broadcast %cst_31 : f32 to vector<1x128xf32>
    %90 = arith.subf %88, %89 : vector<1x128xf32>
    %91 = arith.mulf %83, %90 : vector<1x128xf32>
    %92 = arith.addf %81, %91 : vector<1x128xf32>
    %cst_32 = arith.constant 5.000000e-01 : f32
    %93 = vector.broadcast %cst_32 : f32 to vector<1x128xf32>
    %94 = arith.mulf %93, %82 : vector<1x128xf32>
    %cst_33 = arith.constant 1.000000e+00 : f32
    %95 = vector.broadcast %cst_33 : f32 to vector<1x128xf32>
    %96 = arith.subf %95, %94 : vector<1x128xf32>
    %97 = arith.mulf %82, %82 : vector<1x128xf32>
    %cst_34 = arith.constant 2.44331568E-5 : f32
    %98 = vector.broadcast %cst_34 : f32 to vector<1x128xf32>
    %99 = arith.mulf %98, %82 : vector<1x128xf32>
    %cst_35 = arith.constant 0.00138873165 : f32
    %100 = vector.broadcast %cst_35 : f32 to vector<1x128xf32>
    %101 = arith.subf %99, %100 : vector<1x128xf32>
    %102 = arith.mulf %101, %82 : vector<1x128xf32>
    %cst_36 = arith.constant 0.0416666456 : f32
    %103 = vector.broadcast %cst_36 : f32 to vector<1x128xf32>
    %104 = arith.addf %102, %103 : vector<1x128xf32>
    %105 = arith.mulf %97, %104 : vector<1x128xf32>
    %106 = arith.addf %96, %105 : vector<1x128xf32>
    %107 = arith.fptosi %72 : vector<1x128xf32> to vector<1x128xi32>
    %c1_i32_37 = arith.constant 1 : i32
    %108 = vector.broadcast %c1_i32_37 : i32 to vector<1x128xi32>
    %109 = arith.andi %107, %108 : vector<1x128xi32>
    %c0_i32_38 = arith.constant 0 : i32
    %110 = vector.broadcast %c0_i32_38 : i32 to vector<1x128xi32>
    %111 = arith.cmpi ne, %109, %110 : vector<1x128xi32>
    %112 = arith.select %111, %106, %92 : vector<1x128xi1>, vector<1x128xf32>
    %113 = arith.select %111, %92, %106 : vector<1x128xi1>, vector<1x128xf32>
    %c2_i32_39 = arith.constant 2 : i32
    %114 = vector.broadcast %c2_i32_39 : i32 to vector<1x128xi32>
    %115 = arith.andi %107, %114 : vector<1x128xi32>
    %c0_i32_40 = arith.constant 0 : i32
    %116 = vector.broadcast %c0_i32_40 : i32 to vector<1x128xi32>
    %117 = arith.cmpi ne, %115, %116 : vector<1x128xi32>
    %cst_41 = arith.constant 0.000000e+00 : f32
    %118 = vector.broadcast %cst_41 : f32 to vector<1x128xf32>
    %119 = arith.subf %118, %112 : vector<1x128xf32>
    %120 = arith.select %117, %119, %112 : vector<1x128xi1>, vector<1x128xf32>
    %c1_i32_42 = arith.constant 1 : i32
    %121 = vector.broadcast %c1_i32_42 : i32 to vector<1x128xi32>
    %122 = arith.addi %107, %121 : vector<1x128xi32>
    %c2_i32_43 = arith.constant 2 : i32
    %123 = vector.broadcast %c2_i32_43 : i32 to vector<1x128xi32>
    %124 = arith.andi %122, %123 : vector<1x128xi32>
    %c0_i32_44 = arith.constant 0 : i32
    %125 = vector.broadcast %c0_i32_44 : i32 to vector<1x128xi32>
    %126 = arith.cmpi ne, %124, %125 : vector<1x128xi32>
    %cst_45 = arith.constant 0.000000e+00 : f32
    %127 = vector.broadcast %cst_45 : f32 to vector<1x128xf32>
    %128 = arith.subf %127, %113 : vector<1x128xf32>
    %129 = arith.select %126, %128, %113 : vector<1x128xi1>, vector<1x128xf32>
    %cst_46 = arith.constant 0.636619746 : f32
    %130 = vector.broadcast %cst_46 : f32 to vector<1x128xf32>
    %131 = arith.mulf %5, %130 : vector<1x128xf32>
    %cst_47 = arith.constant 5.000000e-01 : f32
    %132 = vector.broadcast %cst_47 : f32 to vector<1x128xf32>
    %133 = arith.addf %131, %132 : vector<1x128xf32>
    %134 = math.floor %133 : vector<1x128xf32>
    %cst_48 = arith.constant 1.5703125 : f32
    %135 = vector.broadcast %cst_48 : f32 to vector<1x128xf32>
    %136 = arith.mulf %134, %135 : vector<1x128xf32>
    %137 = arith.subf %5, %136 : vector<1x128xf32>
    %cst_49 = arith.constant 4.83751297E-4 : f32
    %138 = vector.broadcast %cst_49 : f32 to vector<1x128xf32>
    %139 = arith.mulf %134, %138 : vector<1x128xf32>
    %140 = arith.subf %137, %139 : vector<1x128xf32>
    %cst_50 = arith.constant 7.549790e-08 : f32
    %141 = vector.broadcast %cst_50 : f32 to vector<1x128xf32>
    %142 = arith.mulf %134, %141 : vector<1x128xf32>
    %143 = arith.subf %140, %142 : vector<1x128xf32>
    %144 = arith.mulf %143, %143 : vector<1x128xf32>
    %145 = arith.mulf %143, %144 : vector<1x128xf32>
    %cst_51 = arith.constant -1.95152956E-4 : f32
    %146 = vector.broadcast %cst_51 : f32 to vector<1x128xf32>
    %147 = arith.mulf %146, %144 : vector<1x128xf32>
    %cst_52 = arith.constant 0.00833216123 : f32
    %148 = vector.broadcast %cst_52 : f32 to vector<1x128xf32>
    %149 = arith.addf %147, %148 : vector<1x128xf32>
    %150 = arith.mulf %149, %144 : vector<1x128xf32>
    %cst_53 = arith.constant 0.166666552 : f32
    %151 = vector.broadcast %cst_53 : f32 to vector<1x128xf32>
    %152 = arith.subf %150, %151 : vector<1x128xf32>
    %153 = arith.mulf %145, %152 : vector<1x128xf32>
    %154 = arith.addf %143, %153 : vector<1x128xf32>
    %cst_54 = arith.constant 5.000000e-01 : f32
    %155 = vector.broadcast %cst_54 : f32 to vector<1x128xf32>
    %156 = arith.mulf %155, %144 : vector<1x128xf32>
    %cst_55 = arith.constant 1.000000e+00 : f32
    %157 = vector.broadcast %cst_55 : f32 to vector<1x128xf32>
    %158 = arith.subf %157, %156 : vector<1x128xf32>
    %159 = arith.mulf %144, %144 : vector<1x128xf32>
    %cst_56 = arith.constant 2.44331568E-5 : f32
    %160 = vector.broadcast %cst_56 : f32 to vector<1x128xf32>
    %161 = arith.mulf %160, %144 : vector<1x128xf32>
    %cst_57 = arith.constant 0.00138873165 : f32
    %162 = vector.broadcast %cst_57 : f32 to vector<1x128xf32>
    %163 = arith.subf %161, %162 : vector<1x128xf32>
    %164 = arith.mulf %163, %144 : vector<1x128xf32>
    %cst_58 = arith.constant 0.0416666456 : f32
    %165 = vector.broadcast %cst_58 : f32 to vector<1x128xf32>
    %166 = arith.addf %164, %165 : vector<1x128xf32>
    %167 = arith.mulf %159, %166 : vector<1x128xf32>
    %168 = arith.addf %158, %167 : vector<1x128xf32>
    %169 = arith.fptosi %134 : vector<1x128xf32> to vector<1x128xi32>
    %c1_i32_59 = arith.constant 1 : i32
    %170 = vector.broadcast %c1_i32_59 : i32 to vector<1x128xi32>
    %171 = arith.andi %169, %170 : vector<1x128xi32>
    %c0_i32_60 = arith.constant 0 : i32
    %172 = vector.broadcast %c0_i32_60 : i32 to vector<1x128xi32>
    %173 = arith.cmpi ne, %171, %172 : vector<1x128xi32>
    %174 = arith.select %173, %168, %154 : vector<1x128xi1>, vector<1x128xf32>
    %175 = arith.select %173, %154, %168 : vector<1x128xi1>, vector<1x128xf32>
    %c2_i32_61 = arith.constant 2 : i32
    %176 = vector.broadcast %c2_i32_61 : i32 to vector<1x128xi32>
    %177 = arith.andi %169, %176 : vector<1x128xi32>
    %c0_i32_62 = arith.constant 0 : i32
    %178 = vector.broadcast %c0_i32_62 : i32 to vector<1x128xi32>
    %179 = arith.cmpi ne, %177, %178 : vector<1x128xi32>
    %cst_63 = arith.constant 0.000000e+00 : f32
    %180 = vector.broadcast %cst_63 : f32 to vector<1x128xf32>
    %181 = arith.subf %180, %174 : vector<1x128xf32>
    %182 = arith.select %179, %181, %174 : vector<1x128xi1>, vector<1x128xf32>
    %c1_i32_64 = arith.constant 1 : i32
    %183 = vector.broadcast %c1_i32_64 : i32 to vector<1x128xi32>
    %184 = arith.addi %169, %183 : vector<1x128xi32>
    %c2_i32_65 = arith.constant 2 : i32
    %185 = vector.broadcast %c2_i32_65 : i32 to vector<1x128xi32>
    %186 = arith.andi %184, %185 : vector<1x128xi32>
    %c0_i32_66 = arith.constant 0 : i32
    %187 = vector.broadcast %c0_i32_66 : i32 to vector<1x128xi32>
    %188 = arith.cmpi ne, %186, %187 : vector<1x128xi32>
    %cst_67 = arith.constant 0.000000e+00 : f32
    %189 = vector.broadcast %cst_67 : f32 to vector<1x128xf32>
    %190 = arith.subf %189, %175 : vector<1x128xf32>
    %191 = arith.select %188, %190, %175 : vector<1x128xi1>, vector<1x128xf32>
    %cst_68 = arith.constant 0.000000e+00 : f32
    %192 = vector.broadcast %cst_68 : f32 to vector<1x128xf32>
    %193 = arith.subf %192, %58 : vector<1x128xf32>
    %cst_69 = arith.constant 0.000000e+00 : f32
    %194 = vector.broadcast %cst_69 : f32 to vector<1x128xf32>
    %195 = arith.subf %194, %120 : vector<1x128xf32>
    %cst_70 = arith.constant 0.000000e+00 : f32
    %196 = vector.broadcast %cst_70 : f32 to vector<1x128xf32>
    %197 = arith.subf %196, %182 : vector<1x128xf32>
    %198 = arith.mulf %193, %195 : vector<1x128xf32>
    %199 = arith.mulf %193, %129 : vector<1x128xf32>
    %200 = arith.mulf %67, %195 : vector<1x128xf32>
    %201 = arith.mulf %67, %129 : vector<1x128xf32>
    %202 = arith.mulf %129, %191 : vector<1x128xf32>
    %203 = arith.mulf %129, %197 : vector<1x128xf32>
    %204 = arith.mulf %198, %191 : vector<1x128xf32>
    %205 = arith.mulf %67, %182 : vector<1x128xf32>
    %206 = arith.addf %204, %205 : vector<1x128xf32>
    %207 = arith.mulf %198, %197 : vector<1x128xf32>
    %208 = arith.mulf %67, %191 : vector<1x128xf32>
    %209 = arith.addf %207, %208 : vector<1x128xf32>
    %210 = arith.mulf %200, %191 : vector<1x128xf32>
    %211 = arith.mulf %58, %182 : vector<1x128xf32>
    %212 = arith.addf %210, %211 : vector<1x128xf32>
    %213 = arith.mulf %200, %197 : vector<1x128xf32>
    %214 = arith.mulf %58, %191 : vector<1x128xf32>
    %215 = arith.addf %213, %214 : vector<1x128xf32>
    %c0_71 = arith.constant 0 : index
    %c0_72 = arith.constant 0 : index
    %c0_73 = arith.constant 0 : index
    %216 = vector.load %arg2[%c0_71, %c0_72, %c0_73] : memref<9x1x128xf32, #tpu.memory_space<vmem>>, vector<1x1x128xf32>
    %217 = vector.shape_cast %216 : vector<1x1x128xf32> to vector<1x128xf32>
    %218 = vector.shape_cast %202 : vector<1x128xf32> to vector<1x1x128xf32>
    tpu.vector_store %arg2[%c0_71, %c0_72, %c0_73], %218 {strides = array<i32>} : memref<9x1x128xf32, #tpu.memory_space<vmem>>, vector<1x1x128xf32>,
    %c1_74 = arith.constant 1 : index
    %c0_75 = arith.constant 0 : index
    %c0_76 = arith.constant 0 : index
    %219 = vector.load %arg2[%c1_74, %c0_75, %c0_76] : memref<9x1x128xf32, #tpu.memory_space<vmem>>, vector<1x1x128xf32>
    %220 = vector.shape_cast %219 : vector<1x1x128xf32> to vector<1x128xf32>
    %221 = vector.shape_cast %203 : vector<1x128xf32> to vector<1x1x128xf32>
    tpu.vector_store %arg2[%c1_74, %c0_75, %c0_76], %221 {strides = array<i32>} : memref<9x1x128xf32, #tpu.memory_space<vmem>>, vector<1x1x128xf32>,
    %c2_77 = arith.constant 2 : index
    %c0_78 = arith.constant 0 : index
    %c0_79 = arith.constant 0 : index
    %222 = vector.load %arg2[%c2_77, %c0_78, %c0_79] : memref<9x1x128xf32, #tpu.memory_space<vmem>>, vector<1x1x128xf32>
    %223 = vector.shape_cast %222 : vector<1x1x128xf32> to vector<1x128xf32>
    %224 = vector.shape_cast %120 : vector<1x128xf32> to vector<1x1x128xf32>
    tpu.vector_store %arg2[%c2_77, %c0_78, %c0_79], %224 {strides = array<i32>} : memref<9x1x128xf32, #tpu.memory_space<vmem>>, vector<1x1x128xf32>,
    %c3 = arith.constant 3 : index
    %c0_80 = arith.constant 0 : index
    %c0_81 = arith.constant 0 : index
    %225 = vector.load %arg2[%c3, %c0_80, %c0_81] : memref<9x1x128xf32, #tpu.memory_space<vmem>>, vector<1x1x128xf32>
    %226 = vector.shape_cast %225 : vector<1x1x128xf32> to vector<1x128xf32>
    %227 = vector.shape_cast %206 : vector<1x128xf32> to vector<1x1x128xf32>
    tpu.vector_store %arg2[%c3, %c0_80, %c0_81], %227 {strides = array<i32>} : memref<9x1x128xf32, #tpu.memory_space<vmem>>, vector<1x1x128xf32>,
    %c4 = arith.constant 4 : index
    %c0_82 = arith.constant 0 : index
    %c0_83 = arith.constant 0 : index
    %228 = vector.load %arg2[%c4, %c0_82, %c0_83] : memref<9x1x128xf32, #tpu.memory_space<vmem>>, vector<1x1x128xf32>
    %229 = vector.shape_cast %228 : vector<1x1x128xf32> to vector<1x128xf32>
    %230 = vector.shape_cast %209 : vector<1x128xf32> to vector<1x1x128xf32>
    tpu.vector_store %arg2[%c4, %c0_82, %c0_83], %230 {strides = array<i32>} : memref<9x1x128xf32, #tpu.memory_space<vmem>>, vector<1x1x128xf32>,
    %c5 = arith.constant 5 : index
    %c0_84 = arith.constant 0 : index
    %c0_85 = arith.constant 0 : index
    %231 = vector.load %arg2[%c5, %c0_84, %c0_85] : memref<9x1x128xf32, #tpu.memory_space<vmem>>, vector<1x1x128xf32>
    %232 = vector.shape_cast %231 : vector<1x1x128xf32> to vector<1x128xf32>
    %233 = vector.shape_cast %199 : vector<1x128xf32> to vector<1x1x128xf32>
    tpu.vector_store %arg2[%c5, %c0_84, %c0_85], %233 {strides = array<i32>} : memref<9x1x128xf32, #tpu.memory_space<vmem>>, vector<1x1x128xf32>,
    %c6 = arith.constant 6 : index
    %c0_86 = arith.constant 0 : index
    %c0_87 = arith.constant 0 : index
    %234 = vector.load %arg2[%c6, %c0_86, %c0_87] : memref<9x1x128xf32, #tpu.memory_space<vmem>>, vector<1x1x128xf32>
    %235 = vector.shape_cast %234 : vector<1x1x128xf32> to vector<1x128xf32>
    %236 = vector.shape_cast %212 : vector<1x128xf32> to vector<1x1x128xf32>
    tpu.vector_store %arg2[%c6, %c0_86, %c0_87], %236 {strides = array<i32>} : memref<9x1x128xf32, #tpu.memory_space<vmem>>, vector<1x1x128xf32>,
    %c7 = arith.constant 7 : index
    %c0_88 = arith.constant 0 : index
    %c0_89 = arith.constant 0 : index
    %237 = vector.load %arg2[%c7, %c0_88, %c0_89] : memref<9x1x128xf32, #tpu.memory_space<vmem>>, vector<1x1x128xf32>
    %238 = vector.shape_cast %237 : vector<1x1x128xf32> to vector<1x128xf32>
    %239 = vector.shape_cast %215 : vector<1x128xf32> to vector<1x1x128xf32>
    tpu.vector_store %arg2[%c7, %c0_88, %c0_89], %239 {strides = array<i32>} : memref<9x1x128xf32, #tpu.memory_space<vmem>>, vector<1x1x128xf32>,
    %c8 = arith.constant 8 : index
    %c0_90 = arith.constant 0 : index
    %c0_91 = arith.constant 0 : index
    %240 = vector.load %arg2[%c8, %c0_90, %c0_91] : memref<9x1x128xf32, #tpu.memory_space<vmem>>, vector<1x1x128xf32>
    %241 = vector.shape_cast %240 : vector<1x1x128xf32> to vector<1x128xf32>
    %242 = vector.shape_cast %201 : vector<1x128xf32> to vector<1x1x128xf32>
    tpu.vector_store %arg2[%c8, %c0_90, %c0_91], %242 {strides = array<i32>} : memref<9x1x128xf32, #tpu.memory_space<vmem>>, vector<1x1x128xf32>,
    return
  }
  func.func @transform_0(%arg0: i32) -> (i32, i32, i32) {
    %c0_i32 = arith.constant 0 : i32
    %c0_i32_0 = arith.constant 0 : i32
    %c0_i32_1 = arith.constant 0 : i32
    return %c0_i32, %arg0, %c0_i32_0 : i32, i32, i32
  }
  func.func @transform_1(%arg0: i32) -> (i32, i32, i32) {
    %c0_i32 = arith.constant 0 : i32
    %c0_i32_0 = arith.constant 0 : i32
    %c0_i32_1 = arith.constant 0 : i32
    return %c0_i32, %arg0, %c0_i32_0 : i32, i32, i32
  }
}

</mosaic_0001>

<bundles_post_ra>
// kernel: tpu_custom_call.1
= control target key start
LH: loop header
LB: loop body
LE: loop exit
PB: predicated region body
PF: predicated region fallthrough
CT: control target
= control target key end

     0   :  { %6 = vsyncpa [#allocation3], 0  ;;  %s361_s0 = inlined_call_operand.hbm [shape: f32[3,1,128], index: 0, kind: input, shape index: {}]   ;;  %s362_s1 = inlined_call_operand.hbm [shape: f32[9,1,128], index: 1, kind: output, shape index: {}]  }
   0x1   :  { %7 = vsyncpa [#allocation4], 0  ;;  %s267_s6 = smov [#allocation2]   ;;  %s219_s10 = scalar_lea.hbm %s361_s0, 48 }
   0x2   :  { %s13_s7 = sshll.u32 %s267_s6, 4  ;;  %p220_p0 = scmp.ne.s32.totalorder %s361_s0, %s219_s10  ;;  %s14_s7 = int_to_ptr.vmem [resolvable:$true] %s13_s7 }
   0x3   :  { %p223_p1 = scmp.lt.u32.totalorder %s219_s10, %s361_s0 }
   0x5   :  { %p225_p2 = pnand %p223_p1, %p220_p0 }
   0x7   :  { %228 = shalt.err (!%p225_p2)
}
   0x8   :  { %s229_s15 = scalar_lea.vmem %s14_s7, 48  ;;  %s233_s16 = scalar_lea.vmem %s14_s7, 64 }
   0x9   :  { %p230_p3 = scmp.ne.s32.totalorder %s14_s7, %s229_s15  ;;  %p234_p4 = scmp.lt.s32.totalorder %s14_s7, %s14_s7 }
   0xa   :  { %p235_p5 = scmp.lt.s32.totalorder %s233_s16, %s229_s15 }
   0xc   :  { %p236_p6 = por %p235_p5, %p234_p4 }
   0xe   :  { %p237_p7 = pnand %p236_p6, %p230_p3 }
  0x10   :  { %240 = shalt.err (!%p237_p7)
}
  0x11   :  { %s268_s17 = smov 16   ;;  %s269_s18 = smov 1  }
  0x12   :  { %19 = dma.hbm_to_vmem [thread:$0]  %s361_s0, 48, %s14_s7, [#allocation3], %s268_s17, %s268_s17, %s269_s18  }
  0x13   :  { %263 = dma.done.wait [#allocation3], 48  }
  0x14   :  { %264 = vsyncadd [#allocation3], 4294967248  ;;  %v25_v0 = vld [vmem:[#allocation2 + $0x1] sm:$0x1]  ;;  %v27_v1 = vld [vmem:[#allocation2 + $0x2] sm:$0x1] }
  0x15   :  { %v23_v2 = vld [vmem:[#allocation2] sm:$0x1]  ;;  %v68_v3 = vmul.f32 0.63661975, %v25_v0  ;;  %v108_v4 = vmul.f32 0.63661975, %v27_v1 }
  0x16   :  { %v28_v5 = vmul.f32 0.63661975, %v23_v2  ;;  %s270_s0 = smov [#allocation5]  }
  0x17   :  { %v69_v6 = vadd.f32 0.5, %v68_v3  ;;  %v109_v7 = vadd.f32 0.5, %v108_v4  ;;  %s191_s21 = sshll.u32 %s270_s0, 4  ;;  %s192_s21 = int_to_ptr.vmem [resolvable:$true] %s191_s21 }
  0x18   :  { %v29_v8 = vadd.f32 0.5, %v28_v5  ;;  %s241_s22 = scalar_lea.vmem %s192_s21, 144  ;;  %s245_s23 = scalar_lea.vmem %s192_s21, 160 }
  0x19   :  { %v70_v9 = vfloor.f32 %v69_v6  ;;  %v110_v10 = vfloor.f32 %v109_v7  ;;  %p242_p8 = scmp.ne.s32.totalorder %s192_s21, %s241_s22  ;;  %p246_p9 = scmp.lt.s32.totalorder %s192_s21, %s192_s21 }
  0x1a   :  { %v30_v11 = vfloor.f32 %v29_v8  ;;  %p247_p10 = scmp.lt.s32.totalorder %s245_s23, %s241_s22 }
  0x1b   :  { %v71_v12 = vmul.f32 1.5703125, %v70_v9  ;;  %v73_v13 = vmul.f32 0.0004837513, %v70_v9  ;;  %v211_v14 = vtrunc.f32 %v70_v9  ;;  %v111_v15 = vmul.f32 1.5703125, %v110_v10 }
  0x1c   :  { %v113_v16 = vmul.f32 0.0004837513, %v110_v10  ;;  %v213_v17 = vtrunc.f32 %v110_v10  ;;  %v75_v19 = vmul.f32 7.54979e-08, %v70_v9  ;;  %v31_v20 = vmul.f32 1.5703125, %v30_v11  ;;  %p248_p11 = por %p247_p10, %p246_p9 }
  0x1d   :  { %v72_v18 = vsub.f32 %v25_v0, %v71_v12  ;;  %v33_v21 = vmul.f32 0.0004837513, %v30_v11  ;;  %v112_v22 = vsub.f32 %v27_v1, %v111_v15  ;;  %v115_v23 = vmul.f32 7.54979e-08, %v110_v10 }
  0x1e   :  { %v296_v25 = vcvt.f32.s32 %v211_v14  ;;  %v214_v26 = vcvt.f32.s32 %v213_v17  ;;  %v32_v27 = vsub.f32 %v23_v2, %v31_v20  ;;  %v35_v29 = vmul.f32 7.54979e-08, %v30_v11  ;;  %p249_p12 = pnand %p248_p11, %p242_p8 }
  0x1f   :  { %v74_v24 = vsub.f32 %v72_v18, %v73_v13  ;;  %v114_v28 = vsub.f32 %v112_v22, %v113_v16  ;;  %v209_v35 = vtrunc.f32 %v30_v11 }
  0x20   :  { %v103_v31 = vadd.s32 1, %v296_v25  ;;  %v143_v32 = vadd.s32 1, %v214_v26  ;;  %v34_v33 = vsub.f32 %v32_v27, %v33_v21  ;;  %v95_v37 = vand.u32 1, %v296_v25 }
  0x21   :  { %v76_v30 = vsub.f32 %v74_v24, %v75_v19  ;;  %v116_v34 = vsub.f32 %v114_v28, %v115_v23  ;;  %v135_v39 = vand.u32 1, %v214_v26  ;;  %v139_v44 = vand.u32 2, %v214_v26 }
  0x22   :  { %v300_v40 = vsub.f32 %v34_v33, %v35_v29  ;;  %v104_v42 = vand.u32 2, %v103_v31  ;;  %v144_v43 = vand.u32 2, %v143_v32  ;;  %v302_v48 = vcvt.f32.s32 %v209_v35 }
  0x23   :  { %v77_v36 = vmul.f32 %v76_v30, %v76_v30  ;;  %v117_v38 = vmul.f32 %v116_v34, %v116_v34  ;;  %vm304_vm0 = vcmp.ne.s32.totalorder %v95_v37, 0  ;;  %v99_v53 = vand.u32 2, %v296_v25 }
  0x24   :  { %vm309_vm1 = vcmp.ne.s32.totalorder %v135_v39, 0  ;;  %v37_v58 = vmul.f32 %v300_v40, %v300_v40  ;;  %vm315_vm2 = vcmp.ne.s32.totalorder %v104_v42, 0  ;;  %vm319_vm3 = vcmp.ne.s32.totalorder %v144_v43, 0 }
  0x25   :  { %v79_v41 = vmul.f32 -0.00019515296, %v77_v36  ;;  %v85_v45 = vmul.f32 0.5, %v77_v36  ;;  %v88_v46 = vmul.f32 2.4433157e-05, %v77_v36  ;;  %v125_v51 = vmul.f32 0.5, %v117_v38 }
  0x26   :  { %v119_v47 = vmul.f32 -0.00019515296, %v117_v38  ;;  %v128_v52 = vmul.f32 2.4433157e-05, %v117_v38  ;;  %v78_v54 = vmul.f32 %v77_v36, %v76_v30  ;;  %v87_v60 = vmul.f32 %v77_v36, %v77_v36 }
  0x27   :  { %v80_v49 = vadd.f32 0.008332161, %v79_v41  ;;  %v206_v55 = vadd.f32 -0.0013887316, %v88_v46  ;;  %v118_v61 = vmul.f32 %v117_v38, %v116_v34  ;;  %v86_v63 = vsub.f32 1.0, %v85_v45 }
  0x28   :  { %v120_v56 = vadd.f32 0.008332161, %v119_v47  ;;  %v208_v62 = vadd.f32 -0.0013887316, %v128_v52  ;;  %v39_v3 = vmul.f32 -0.00019515296, %v37_v58  ;;  %v127_v6 = vmul.f32 %v117_v38, %v117_v38 }
  0x29   :  { %v81_v59 = vmul.f32 %v80_v49, %v77_v36  ;;  %v90_v0 = vmul.f32 %v206_v55, %v77_v36  ;;  %v126_v5 = vsub.f32 1.0, %v125_v51  ;;  %vm323_vm4 = vcmp.ne.s32.totalorder %v139_v44, 0 }
  0x2a   :  { %v121_v2 = vmul.f32 %v120_v56, %v117_v38  ;;  %v130_v7 = vmul.f32 %v208_v62, %v117_v38  ;;  %v40_v12 = vadd.f32 0.008332161, %v39_v3  ;;  %v38_v15 = vmul.f32 %v37_v58, %v300_v40 }
  0x2b   :  { %v205_v4 = vadd.f32 -0.16666655, %v81_v59  ;;  %v91_v10 = vadd.f32 0.041666646, %v90_v0  ;;  %v48_v16 = vmul.f32 2.4433157e-05, %v37_v58  ;;  %v47_v31 = vmul.f32 %v37_v58, %v37_v58 }
  0x2c   :  { %v207_v11 = vadd.f32 -0.16666655, %v121_v2  ;;  %v131_v14 = vadd.f32 0.041666646, %v130_v7  ;;  %v41_v19 = vmul.f32 %v40_v12, %v37_v58  ;;  %v45_v20 = vmul.f32 0.5, %v37_v58 }
  0x2d   :  { %v83_v13 = vmul.f32 %v205_v4, %v78_v54  ;;  %v92_v17 = vmul.f32 %v91_v10, %v87_v60  ;;  %v204_v23 = vadd.f32 -0.0013887316, %v48_v16  ;;  %v55_v24 = vand.u32 1, %v302_v48 }
  0x2e   :  { %v123_v18 = vmul.f32 %v207_v11, %v118_v61  ;;  %v132_v22 = vmul.f32 %v131_v14, %v127_v6  ;;  %v203_v27 = vadd.f32 -0.16666655, %v41_v19  ;;  %v63_v28 = vadd.s32 1, %v302_v48 }
  0x2f   :  { %v84_v21 = vadd.f32 %v83_v13, %v76_v30  ;;  %v93_v25 = vadd.f32 %v92_v17, %v86_v63  ;;  %v50_v32 = vmul.f32 %v204_v23, %v37_v58  ;;  %v59_v33 = vand.u32 2, %v302_v48 }
  0x30   :  { %v124_v26 = vadd.f32 %v123_v18, %v116_v34  ;;  %v133_v29 = vadd.f32 %v132_v22, %v126_v5  ;;  %v43_v36 = vmul.f32 %v203_v27, %v38_v15  ;;  %v46_v37 = vsub.f32 1.0, %v45_v20 }
  0x31   :  { %v98_v35 = vsel %vm304_vm0, %v84_v21, %v93_v25  ;;  %v97_v30 = vsel %vm304_vm0, %v93_v25, %v84_v21  ;;  %v51_v41 = vadd.f32 0.041666646, %v50_v32  ;;  %v64_v44 = vand.u32 2, %v63_v28 }
  0x32   :  { %v106_v38 = vsub.f32 0.0, %v98_v35  ;;  %v138_v34 = vsel %vm309_vm1, %v124_v26, %v133_v29  ;;  %v137_v39 = vsel %vm309_vm1, %v133_v29, %v124_v26  ;;  %vm100_vm5 = vcmp.ne.s32.totalorder %v99_v53, 0 }
  0x33   :  { %v146_v42 = vsub.f32 0.0, %v138_v34  ;;  %v141_v43 = vsub.f32 0.0, %v137_v39  ;;  %v44_v46 = vadd.f32 %v43_v36, %v300_v40  ;;  %v52_v47 = vmul.f32 %v51_v41, %v47_v31 }
  0x34   :  { %v107_v45 = vsel %vm315_vm2, %v106_v38, %v98_v35  ;;  %v101_v48 = vsub.f32 0.0, %v97_v30  ;;  %vm56_vm6 = vcmp.ne.s32.totalorder %v55_v24, 0  ;;  %vm60_vm7 = vcmp.ne.s32.totalorder %v59_v33, 0 }
  0x35   :  { %v147_v49 = vsel %vm319_vm3, %v146_v42, %v138_v34  ;;  %v142_v50 = vsel %vm323_vm4, %v141_v43, %v137_v39  ;;  %v53_v54 = vadd.f32 %v52_v47, %v46_v37  ;;  %vm65_vm8 = vcmp.ne.s32.totalorder %v64_v44, 0 }
  0x36   :  { %v155_v51 = vmul.f32 %v147_v49, %v107_v45  ;;  %v150_v52 = vsub.f32 0.0, %v142_v50  ;;  %v102_v55 = vsel %vm100_vm5, %v101_v48, %v97_v30 }
  0x37   :  { %173 = vst [vmem:[#allocation5 + $0x2] sm:$0x1] %v102_v55  ;;  %v57_v56 = vsel %vm56_vm6, %v53_v54, %v44_v46  ;;  %v58_v40 = vsel %vm56_vm6, %v44_v46, %v53_v54  ;;  %v149_v57 = vsub.f32 0.0, %v102_v55 }
  0x38   :  { %169 = vst [vmem:[#allocation5] sm:$0x1] %v155_v51  ;;  %v156_v53 = vmul.f32 %v150_v52, %v107_v45  ;;  %v61_v58 = vsub.f32 0.0, %v57_v56  ;;  %v66_v59 = vsub.f32 0.0, %v58_v40 }
  0x3a   :  { %171 = vst [vmem:[#allocation5 + $0x1] sm:$0x1] %v156_v53  ;;  %v62_v60 = vsel %vm60_vm7, %v61_v58, %v57_v56  ;;  %v67_v61 = vsel %vm65_vm8, %v66_v59, %v58_v40 }
  0x3b   :  { %v148_v62 = vsub.f32 0.0, %v62_v60  ;;  %v153_v63 = vmul.f32 %v149_v57, %v67_v61  ;;  %v158_v0 = vmul.f32 %v142_v50, %v67_v61  ;;  %v161_v1 = vmul.f32 %v147_v49, %v67_v61 }
  0x3c   :  { %v164_v2 = vmul.f32 %v142_v50, %v62_v60  ;;  %v167_v3 = vmul.f32 %v147_v49, %v62_v60  ;;  %v154_v4 = vmul.f32 %v107_v45, %v67_v61 }
  0x3d   :  { %v151_v5 = vmul.f32 %v149_v57, %v148_v62  ;;  %v152_v6 = vmul.f32 %v148_v62, %v107_v45  ;;  %v163_v7 = vmul.f32 %v153_v63, %v147_v49  ;;  %v166_v8 = vmul.f32 %v153_v63, %v150_v52 }
  0x3e   :  { %185 = vst [vmem:[#allocation5 + $0x8] sm:$0x1] %v154_v4 }
  0x3f   :  { %v157_v9 = vmul.f32 %v151_v5, %v147_v49  ;;  %v160_v10 = vmul.f32 %v151_v5, %v150_v52  ;;  %179 = vst [vmem:[#allocation5 + $0x5] sm:$0x1] %v152_v6  ;;  %v165_v11 = vadd.f32 %v164_v2, %v163_v7  ;;  %v168_v12 = vadd.f32 %v167_v3, %v166_v8 }
  0x41   :  { %v159_v13 = vadd.f32 %v158_v0, %v157_v9  ;;  %v162_v14 = vadd.f32 %v161_v1, %v160_v10  ;;  %181 = vst [vmem:[#allocation5 + $0x6] sm:$0x1] %v165_v11  ;;  %183 = vst [vmem:[#allocation5 + $0x7] sm:$0x1] %v168_v12 }
  0x43   :  { %175 = vst [vmem:[#allocation5 + $0x3] sm:$0x1] %v159_v13  ;;  %177 = vst [vmem:[#allocation5 + $0x4] sm:$0x1] %v162_v14 }
  0x44   :  { %252 = shalt.err (!%p249_p12)
}
  0x45   :  { %s253_s26 = scalar_lea.hbm %s362_s1, 144 }
  0x46   :  { %p254_p13 = scmp.ne.s32.totalorder %s362_s1, %s253_s26  ;;  %p257_p0 = scmp.lt.u32.totalorder %s253_s26, %s362_s1 }
  0x48   :  { %p259_p1 = pnand %p257_p0, %p254_p13 }
  0x4a   :  { %262 = shalt.err (!%p259_p1)
}
  0x4b   :  { %197 = dma.vmem_to_hbm [thread:$0]  %s192_s21, 144, %s362_s1, [#allocation4], %s268_s17, %s268_s17, %s269_s18  }
  0x4c   :  { %265 = dma.done.wait [#allocation4], 144  }
  0x4d   :  { %266 = vsyncadd [#allocation4], 4294967152 }
  0x4e   :  { %201 = vsyncpa [#allocation3], 1 }
  0x4f   :  { %202 = vsyncpa [#allocation4], 1 }

</bundles_post_ra>
